<compile_context>
chip_gen: v7x
topology: tpu7x:2x2x1
jax: 0.10.0
libtpu: 0.0.40
codegen_flags: <defaults>
</compile_context>

<pallas_src>
import numpy as np
import jax
import jax.numpy as jnp
from jax.experimental import pallas as pl
from jax.experimental.pallas import tpu as pltpu


def _round_up(x, m):
    return ((x + m - 1) // m) * m


def _obs_noise_kernel(x_ref, w1_ref, b1_ref, w2_ref, extras_ref, out_ref):
    # x_ref:      (Bt, Dz)
    # w1_ref:     (Dz, H)     b1_ref: (1, H)
    # w2_ref:     (H, Dz)
    # extras_ref: (2, Dz)     row 0 = b2 + 0.001, row 1 = sqrt(r_diag^2 - 0.001)
    # out_ref:    (Bt, Dz)    lane-dense diagonal; diag_embed done outside.
    x = x_ref[...]

    # fc1 + relu
    h = jnp.dot(x, w1_ref[...], preferred_element_type=jnp.float32) + b1_ref[...]
    h = jnp.maximum(h, 0.0)

    # fc2 with the +0.001 constant pre-folded into the bias
    d = jnp.dot(h, w2_ref[...], preferred_element_type=jnp.float32) + extras_ref[0:1, :]

    # (fc2(x) + 0.001)^2 + sqrt(r_diag^2 - 0.001)
    out_ref[...] = jnp.square(d) + extras_ref[1:2, :]


def new_observation_noise(inputs, params, r_diag, *, block_b=1024, return_diag=False):
    """
    inputs: [batch, 1, dim_z] float32
    params: dict with w1 [dim_z,32], b1 [32], w2 [32,dim_z], b2 [dim_z]
    r_diag: array [dim_z]
    returns R: [batch, dim_z, dim_z]  (or the diagonal [batch, dim_z] if
             return_diag=True, for consumers that never need dense R)
    """
    b, k, dim_z = inputs.shape
    assert k == 1
    n = b * k
    x = inputs.reshape(n, dim_z).astype(jnp.float32)

    # jit-safe; NaN if r_diag^2 < 0.001, same as the PyTorch module.
    r_diag = jnp.asarray(r_diag, dtype=jnp.float32)
    init = jnp.sqrt(jnp.square(r_diag) - 0.001).reshape(1, dim_z)

    w1 = params["w1"].astype(jnp.float32)                  # (dim_z, H)
    b1 = params["b1"].reshape(1, -1).astype(jnp.float32)   # (1, H)
    w2 = params["w2"].astype(jnp.float32)                  # (H, dim_z)
    b2 = params["b2"].reshape(1, -1).astype(jnp.float32)   # (1, dim_z)
    hidden = w1.shape[1]

    # Pack (b2 + 0.001) and init into one small resident array: (2, dim_z).
    extras = jnp.concatenate([b2 + 0.001, init], axis=0)

    # Batch tile: multiple of 8 sublanes, capped at block_b; for n >= 16 also
    # capped so the grid has >= 2 steps (v7x megacore sharding). Batch is
    # padded so the grid divides evenly; padded rows are sliced off below.
    bt = min(block_b, _round_up(n, 8))
    if n >= 16:
        bt = min(bt, _round_up((n + 1) // 2, 8))
    bt = max(bt, 8)
    n_pad = _round_up(n, bt)
    if n_pad != n:
        x = jnp.pad(x, ((0, n_pad - n), (0, 0)))
    grid = (n_pad // bt,)

    resident = lambda i: (0, 0)   # weights / biases / init stay in VMEM

    diag_out = pl.pallas_call(
        _obs_noise_kernel,
        out_shape=jax.ShapeDtypeStruct((n_pad, dim_z), jnp.float32),
        grid_spec=pltpu.PrefetchScalarGridSpec(
            num_scalar_prefetch=0,
            grid=grid,
            in_specs=[
                pl.BlockSpec((bt, dim_z), lambda i: (i, 0)),      # x
                pl.BlockSpec((dim_z, hidden), resident),          # w1
                pl.BlockSpec((1, hidden), resident),              # b1
                pl.BlockSpec((hidden, dim_z), resident),          # w2
                pl.BlockSpec((2, dim_z), resident),               # b2+c / init
            ],
            out_specs=pl.BlockSpec((bt, dim_z), lambda i: (i, 0)),
        ),
        compiler_params=pltpu.CompilerParams(
            dimension_semantics=("parallel",),
        ),
    )(x, w1, b1, w2, extras)

    d = diag_out[:n]                                   # [n, dim_z] lane-dense
    if return_diag:
        return d
    # diag_embed (pure layout) outside the kernel: R[b, i, j] = d[b, i] * (i==j)
    eye = jnp.eye(dim_z, dtype=d.dtype)
    return d[:, :, None] * eye[None, :, :]             # [n, dim_z, dim_z]


def _reference(inputs, params, r_diag):
    b, k, dim_z = inputs.shape
    constant = np.ones(dim_z, dtype=np.float32) * 0.001
    init = np.sqrt(np.square(np.asarray(r_diag, dtype=np.float32)) - constant)
    x = np.asarray(inputs).reshape(b * k, dim_z)
    h = np.maximum(x @ np.asarray(params["w1"]) + np.asarray(params["b1"]), 0.0)
    d = h @ np.asarray(params["w2"]) + np.asarray(params["b2"])
    d = np.square(d + constant[None, :]) + init[None, :]
    R = np.zeros((b * k, dim_z, dim_z), dtype=np.float32)
    idx = np.arange(dim_z)
    R[:, idx, idx] = d
    return R


if __name__ == "__main__":
    dim_z = 14
    hidden = 32

    key = jax.random.PRNGKey(0)
    k_in, k_in2, k_w1, k_b1, k_w2, k_b2 = jax.random.split(key, 6)

    # Deterministic parameter init (PyTorch-Linear-style uniform bounds).
    bound1 = 1.0 / np.sqrt(dim_z)
    bound2 = 1.0 / np.sqrt(hidden)
    params = {
        "w1": jax.random.uniform(k_w1, (dim_z, hidden), jnp.float32, -bound1, bound1),
        "b1": jax.random.uniform(k_b1, (hidden,), jnp.float32, -bound1, bound1),
        "w2": jax.random.uniform(k_w2, (hidden, dim_z), jnp.float32, -bound2, bound2),
        "b2": jax.random.uniform(k_b2, (dim_z,), jnp.float32, -bound2, bound2),
    }

    r_diag = np.ones(dim_z, dtype=np.float32) * 0.1  # r_diag^2 - 0.001 >= 0

    # Small batch (single grid step path).
    batch = 4
    inputs = jax.random.normal(k_in, (batch, 1, dim_z), jnp.float32)
    R = jax.block_until_ready(new_observation_noise(inputs, params, r_diag))
    np.testing.assert_allclose(
        np.asarray(R), _reference(inputs, params, r_diag), rtol=1e-5, atol=1e-5)
    assert R.shape == (batch, dim_z, dim_z)

    # Slightly larger batch to exercise the >=2-grid-step (multi-tile) path.
    batch2 = 20
    inputs2 = jax.random.normal(k_in2, (batch2, 1, dim_z), jnp.float32)
    R2 = jax.block_until_ready(new_observation_noise(inputs2, params, r_diag))
    np.testing.assert_allclose(
        np.asarray(R2), _reference(inputs2, params, r_diag), rtol=1e-5, atol=1e-5)
    assert R2.shape == (batch2, dim_z, dim_z)

    print("KERNEL_OK")
</pallas_src>

<mosaic_0001>
module attributes {stable_mosaic.version = 11 : i64} {
  func.func @_obs_noise_kernel(%arg0: i32, %arg1: memref<8x14xf32, #tpu.memory_space<vmem>>, %arg2: memref<14x32xf32, #tpu.memory_space<vmem>>, %arg3: memref<1x32xf32, #tpu.memory_space<vmem>>, %arg4: memref<32x14xf32, #tpu.memory_space<vmem>>, %arg5: memref<2x14xf32, #tpu.memory_space<vmem>>, %arg6: memref<8x14xf32, #tpu.memory_space<vmem>>) attributes {dimension_semantics = [#tpu.dimension_semantics<parallel>], iteration_bounds = array<i64: 1>, scalar_prefetch = 0 : i64, scratch_operands = 0 : i64, tpu.core_type = #tpu.core_type<tc>, window_params = [{transform_indices = @transform_0, window_bounds = array<i64: 8, 14>}, {pipeline_mode = #tpu.pipeline_mode<synchronous>, transform_indices = @transform_1, window_bounds = array<i64: 14, 32>}, {pipeline_mode = #tpu.pipeline_mode<synchronous>, transform_indices = @transform_2, window_bounds = array<i64: 1, 32>}, {pipeline_mode = #tpu.pipeline_mode<synchronous>, transform_indices = @transform_3, window_bounds = array<i64: 32, 14>}, {pipeline_mode = #tpu.pipeline_mode<synchronous>, transform_indices = @transform_4, window_bounds = array<i64: 2, 14>}, {transform_indices = @transform_5, window_bounds = array<i64: 8, 14>}]} {
    %c0 = arith.constant 0 : index
    %c0_0 = arith.constant 0 : index
    %0 = vector.load %arg1[%c0, %c0_0] : memref<8x14xf32, #tpu.memory_space<vmem>>, vector<8x14xf32>
    %c0_1 = arith.constant 0 : index
    %c0_2 = arith.constant 0 : index
    %1 = vector.load %arg2[%c0_1, %c0_2] : memref<14x32xf32, #tpu.memory_space<vmem>>, vector<14x32xf32>
    %cst = arith.constant dense<0.000000e+00> : vector<8x32xf32>
    %2 = tpu.matmul %0, %1, %cst {dimension_numbers = #tpu.dot_dimension_numbers<[1], [0], [0], [1], [0, 0, 1, 1], [], []>} : vector<8x14xf32>, vector<14x32xf32>, vector<8x32xf32> -> vector<8x32xf32>
    %c0_3 = arith.constant 0 : index
    %c0_4 = arith.constant 0 : index
    %3 = vector.load %arg3[%c0_3, %c0_4] : memref<1x32xf32, #tpu.memory_space<vmem>>, vector<1x32xf32>
    %4 = vector.broadcast %3 : vector<1x32xf32> to vector<8x32xf32>
    %5 = arith.addf %2, %4 : vector<8x32xf32>
    %cst_5 = arith.constant 0.000000e+00 : f32
    %6 = vector.broadcast %cst_5 : f32 to vector<8x32xf32>
    %7 = arith.maximumf %5, %6 : vector<8x32xf32>
    %c0_6 = arith.constant 0 : index
    %c0_7 = arith.constant 0 : index
    %8 = vector.load %arg4[%c0_6, %c0_7] : memref<32x14xf32, #tpu.memory_space<vmem>>, vector<32x14xf32>
    %cst_8 = arith.constant dense<0.000000e+00> : vector<8x14xf32>
    %9 = tpu.matmul %7, %8, %cst_8 {dimension_numbers = #tpu.dot_dimension_numbers<[1], [0], [0], [1], [0, 0, 1, 1], [], []>} : vector<8x32xf32>, vector<32x14xf32>, vector<8x14xf32> -> vector<8x14xf32>
    %c0_9 = arith.constant 0 : index
    %c0_10 = arith.constant 0 : index
    %10 = vector.load %arg5[%c0_9, %c0_10] : memref<2x14xf32, #tpu.memory_space<vmem>>, vector<1x14xf32>
    %11 = vector.broadcast %10 : vector<1x14xf32> to vector<8x14xf32>
    %12 = arith.addf %9, %11 : vector<8x14xf32>
    %13 = arith.mulf %12, %12 : vector<8x14xf32>
    %c1 = arith.constant 1 : index
    %c0_11 = arith.constant 0 : index
    %14 = vector.load %arg5[%c1, %c0_11] : memref<2x14xf32, #tpu.memory_space<vmem>>, vector<1x14xf32>
    %15 = vector.broadcast %14 : vector<1x14xf32> to vector<8x14xf32>
    %16 = arith.addf %13, %15 : vector<8x14xf32>
    %c0_12 = arith.constant 0 : index
    %c0_13 = arith.constant 0 : index
    %17 = vector.load %arg6[%c0_12, %c0_13] : memref<8x14xf32, #tpu.memory_space<vmem>>, vector<8x14xf32>
    tpu.vector_store %arg6[%c0_12, %c0_13], %16 {strides = array<i32>} : memref<8x14xf32, #tpu.memory_space<vmem>>, vector<8x14xf32>,
    return
  }
  func.func @transform_0(%arg0: i32) -> (i32, i32) {
    %c0_i32 = arith.constant 0 : i32
    %c0_i32_0 = arith.constant 0 : i32
    return %arg0, %c0_i32 : i32, i32
  }
  func.func @transform_1(%arg0: i32) -> (i32, i32) {
    %c0_i32 = arith.constant 0 : i32
    %c0_i32_0 = arith.constant 0 : i32
    %c0_i32_1 = arith.constant 0 : i32
    return %c0_i32, %c0_i32_0 : i32, i32
  }
  func.func @transform_2(%arg0: i32) -> (i32, i32) {
    %c0_i32 = arith.constant 0 : i32
    %c0_i32_0 = arith.constant 0 : i32
    %c0_i32_1 = arith.constant 0 : i32
    return %c0_i32, %c0_i32_0 : i32, i32
  }
  func.func @transform_3(%arg0: i32) -> (i32, i32) {
    %c0_i32 = arith.constant 0 : i32
    %c0_i32_0 = arith.constant 0 : i32
    %c0_i32_1 = arith.constant 0 : i32
    return %c0_i32, %c0_i32_0 : i32, i32
  }
  func.func @transform_4(%arg0: i32) -> (i32, i32) {
    %c0_i32 = arith.constant 0 : i32
    %c0_i32_0 = arith.constant 0 : i32
    %c0_i32_1 = arith.constant 0 : i32
    return %c0_i32, %c0_i32_0 : i32, i32
  }
  func.func @transform_5(%arg0: i32) -> (i32, i32) {
    %c0_i32 = arith.constant 0 : i32
    %c0_i32_0 = arith.constant 0 : i32
    return %arg0, %c0_i32 : i32, i32
  }
}

</mosaic_0001>

<bundles_post_ra>
// kernel: tpu_custom_call.1
= control target key start
LH: loop header
LB: loop body
LE: loop exit
PB: predicated region body
PF: predicated region fallthrough
CT: control target
= control target key end

     0   :  { %vm35_vm0 = vcmask 1045504   ;;  %v286_v2 = vmov 0.0|0.0   ;;  %vm287_vm1 = vmmov 1   ;;  %vm288_vm3 = vmmov 0   ;;  %s365_s0 = inlined_call_operand.vmem [shape: f32[8,14], index: 0, kind: input, shape index: {}]   ;;  %s366_s1 = inlined_call_operand.vmem [shape: f32[14,32], index: 1, kind: input, shape index: {}]   ;;  %s367_s2 = inlined_call_operand.vmem [shape: f32[1,32], index: 2, kind: input, shape index: {}]   ;;  %s368_s3 = inlined_call_operand.vmem [shape: f32[32,14], index: 3, kind: input, shape index: {}]   ;;  %s369_s4 = inlined_call_operand.vmem [shape: f32[2,14], index: 4, kind: input, shape index: {}]   ;;  %s370_s5 = inlined_call_operand.hbm [shape: f32[8,14], index: 5, kind: output, shape index: {}]  }
   0x1   :  { %v22_v0 = vld [vmem:[%s366_s1] sm:$0xff]  ;;  %v23_v1 = vld [vmem:[%s366_s1 + $0x8] sm:$0x3f]  ;;  %247 = vmatprep.subr.bf16.mxu0 %v286_v2  ;;  %vm249_vm2 = vmpackc.low %vm35_vm0, %vm287_vm1  ;;  %251 = vmatprep.subr.bf16.mxu1 %v286_v2  ;;  %v289_v5 = vmov 0.0  }
   0x2   :  { %v248_v3 = vpack.c.bf16 %v23_v1, %v22_v0  ;;  %v110_v4 = vld [vmem:[%s368_s3] sm:$0xff]  ;;  %233 = vmatprep.mubr.msk.f32.mxu0 %vm288_vm3, %v289_v5  ;;  %v111_v6 = vld [vmem:[%s368_s3 + $0x8] sm:$0xff]  ;;  %244 = vmatprep.mubr.msk.f32.mxu1 %vm288_vm3, %v289_v5 }
   0x3   :  { %10 = vsyncpa [#allocation3], 0  ;;  %v21_v7 = vld [vmem:[%s365_s0] sm:$0xff]  ;;  %vm31_vm4 = vcmask 113664   ;;  %v252_v8 = vpack.c.bf16 %v111_v6, %v110_v4  ;;  %v112_v9 = vld [vmem:[%s368_s3 + $0x10] sm:$0xff]  ;;  %vm119_vm5 = vcmask 261120  }
   0x4   :  { %250 = vmatpush3.bf16.msk.msra.mxu0 %vm249_vm2, %v248_v3  ;;  %v113_v10 = vld [vmem:[%s368_s3 + $0x18] sm:$0xff]  ;;  %v215_v12 = vld [vmem:[%s367_s2] ss:$0 sm:$0xff]  ;;  %v220_v21 = vld [vmem:[%s369_s4 + $0x1] ss:$0 sm:$0xff]  ;;  %s290_s10 = smov [#allocation2]  }
   0x5   :  { %253 = vmatpush3.bf16.msra.mxu1 %v252_v8  ;;  %v255_v11 = vpack.c.bf16 %v113_v10, %v112_v9  ;;  %v218_v17 = vld [vmem:[%s369_s4] ss:$0 sm:$0xff]  ;;  %s207_s11 = sshll.u32 %s290_s10, 4  ;;  %s208_s11 = int_to_ptr.vmem [resolvable:$true] %s207_s11 }
   0x6   :  { %254 = vmatprep.subr.bf16.mxu1 %v286_v2  ;;  %s262_s2 = scalar_lea.vmem %s208_s11, 128  ;;  %p267_p1 = scmp.lt.s32.totalorder %s208_s11, %s208_s11 }
   0x7   :  { %234 = vmatmul.mubr.msk.f32.vlgmr.msra.gmra.mrb[0].mxu0 %vm31_vm4, %v21_v7  ;;  %p263_p0 = scmp.ne.s32.totalorder %s208_s11, %s262_s2  ;;  %p268_p2 = scmp.lt.s32.totalorder %s262_s2, %s262_s2 }
   0x9   :  { %256 = vmatpush3.bf16.msra.mxu1 %v255_v11  ;;  %p269_p3 = por %p268_p2, %p267_p1 }
   0xb   :  { %p270_p4 = pnand %p269_p3, %p263_p0 }
  0xda   :  { %v105_v13 = vpop.f32.mrb[0].mxu0 }
  0xdb   :  { %v106_v14 = vadd.f32 %v215_v12, %v105_v13  ;;  %v235_v15 = vpop.f32.mrb[1].mxu0 }
  0xdd   :  { %v109_v16 = vmax.f32 %v106_v14, 0.0 }
  0xdf   :  { %245 = vmatmul.mubr.msk.f32.vlgmr.msra.gmra.mrb[0].mxu1 %vm119_vm5, %v109_v16 }
 0x1b2   :  { %v189_v18 = vpop.f32.mrb[0].mxu1 }
 0x1b3   :  { %v190_v19 = vadd.f32 %v218_v17, %v189_v18  ;;  %v246_v20 = vpop.f32.mrb[1].mxu1 }
 0x1b5   :  { %v193_v22 = vmul.f32 %v190_v19, %v190_v19 }
 0x1b7   :  { %v199_v23 = vadd.f32 %v220_v21, %v193_v22 }
 0x1b9   :  { %200 = vst.msk [vmem:[#allocation2] sm:$0xff] %vm31_vm4, %v199_v23 }
 0x1ba   :  { %273 = shalt.err (!%p270_p4)
}
 0x1bb   :  { %s274_s14 = scalar_lea.hbm %s370_s5, 128 }
 0x1bc   :  { %p275_p5 = scmp.ne.s32.totalorder %s370_s5, %s274_s14  ;;  %p278_p6 = scmp.lt.u32.totalorder %s274_s14, %s370_s5 }
 0x1be   :  { %p280_p7 = pnand %p278_p6, %p275_p5 }
 0x1c0   :  { %283 = shalt.err (!%p280_p7)
}
 0x1c1   :  { %210 = dma.vmem_to_hbm [thread:$0]  %s208_s11, 128, %s370_s5, [#allocation3]  }
 0x1c2   :  { %284 = dma.done.wait [#allocation3], 128  }
 0x1c3   :  { %285 = vsyncadd [#allocation3], 4294967168 }
 0x1c4   :  { %214 = vsyncpa [#allocation3], 1 }

</bundles_post_ra>
